<compile_context>
chip_gen: v7x
topology: tpu7x:2x2x1
jax: 0.10.0
libtpu: 0.0.40
codegen_flags: <defaults>
</compile_context>

<pallas_src>
import functools

import jax
import jax.numpy as jnp
from jax import lax
from jax.experimental import pallas as pl
from jax.experimental.pallas import tpu as pltpu

_LANES = 128
_CHUNK = 512                      # rows per inner compute step (bounds temporaries)
_TILE_BYTES = 2 * 1024 * 1024     # per-input, per-pipeline-buffer DMA tile
_VMEM_LIMIT = 40 * 1024 * 1024    # > v5e's 16 MiB default, < v7x's 64 MiB physical


def _round_up(x, m):
    return (x + m - 1) // m * m


def _num_tensorcores():
    """Best-effort TensorCores per JAX device (megacore / v7x -> 2)."""
    try:
        kind = jax.devices()[0].device_kind.lower()
    except Exception:
        return 2
    # Single-TensorCore inference chips.
    if any(t in kind for t in ("v5e", "v5 lite", "v5litepod", "v6e", "v6 lite")):
        return 1
    return 2


def _interaction_loss_kernel(gt_acted_ref, gt_action_ref,
                             pred_acted_ref, pred_action_ref,
                             change_acted_ref, change_action_ref,
                             sq1_ref, sq2_ref, ce_ref,
                             *, steps_per_split, tile_rows, chunk_rows,
                             valid_rows, needs_mask):
    s = pl.program_id(0)   # parallel split (TensorCore shard on megacore/v7x)
    i = pl.program_id(1)   # reduction step within this split

    @pl.when(i == 0)
    def _init():
        sq1_ref[...] = jnp.zeros_like(sq1_ref)
        sq2_ref[...] = jnp.zeros_like(sq2_ref)
        ce_ref[...] = jnp.zeros_like(ce_ref)

    # Row offset of this block in the *logical* (unclamped) row space; only used
    # by the validity mask.  The index_map clamps the actual DMA in-bounds.
    block_row0 = (s * steps_per_split + i) * tile_rows
    n_chunks = tile_rows // chunk_rows

    def fold(x):
        # (chunk_rows, 128) -> (8, 128): sublane-aligned vreg adds only, no XLU.
        return x.reshape(chunk_rows // 8, 8, _LANES).sum(axis=0)

    @pl.loop(0, n_chunks)
    def _per_chunk(c):
        r0 = pl.multiple_of(c * chunk_rows, chunk_rows)
        rows_sl = pl.ds(r0, chunk_rows)
        gt_a = gt_acted_ref[rows_sl, :].astype(jnp.float32)
        gt_b = gt_action_ref[rows_sl, :].astype(jnp.float32)
        p_a = pred_acted_ref[rows_sl, :].astype(jnp.float32)
        p_b = pred_action_ref[rows_sl, :].astype(jnp.float32)
        c_a = change_acted_ref[rows_sl, :].astype(jnp.float32)
        c_b = change_action_ref[rows_sl, :].astype(jnp.float32)

        # torch.norm(x, 2) == sqrt(sum(x**2)): accumulate sum-of-squares here,
        # sqrt runs once in the tiny XLA epilogue.
        d1 = c_a - p_a + gt_b
        d2 = c_b - p_b + gt_a
        # cross_entropy(change, res, gt) = sum(change * log(|res / (gt + 1)|)).
        # If profiling ever shows the single EUP binding (bf16 on v7x), rewrite
        # as log(|res|) - log(gt + 1) to drop the divide.
        ce = (c_a * jnp.log(jnp.abs(p_a / (gt_b + 1.0)))
              + c_b * jnp.log(jnp.abs(p_b / (gt_a + 1.0))))

        if needs_mask:
            # Ragged tail block reads past the array end: OOB VMEM contents are
            # undefined, so zero every contribution from invalid rows.  Row-level
            # compare (no *128) keeps the index math safely inside int32.
            row_ids = lax.broadcasted_iota(jnp.int32, (chunk_rows, _LANES), 0)
            valid = (block_row0 + r0 + row_ids) < valid_rows
            d1 = jnp.where(valid, d1, 0.0)
            d2 = jnp.where(valid, d2, 0.0)
            ce = jnp.where(valid, ce, 0.0)

        sq1_ref[0] += fold(d1 * d1)
        sq2_ref[0] += fold(d2 * d2)
        ce_ref[0] += fold(ce)


def interaction_loss(predict, ground_true):
    """predict = (pred_acted, pred_action, change_acted, change_action)
       ground_true = (gt_acted, gt_action). All six tensors share one size."""
    pred_acted, pred_action, change_acted, change_action = predict
    gt_acted, gt_action = ground_true

    inputs = [jnp.asarray(a) for a in (gt_acted, gt_action,
                                       pred_acted, pred_action,
                                       change_acted, change_action)]
    n = inputs[0].size
    assert n > 0
    for a in inputs:
        assert a.size == n, "all six tensors must share one size"

    itemsize = max(a.dtype.itemsize for a in inputs)
    rows = pl.cdiv(n, _LANES)

    # --- Tile plan -----------------------------------------------------------
    if rows <= _CHUNK:
        tile_rows = _round_up(rows, 8)
        chunk = tile_rows
    else:
        target = max(_CHUNK, (_TILE_BYTES // (_LANES * itemsize)) // _CHUNK * _CHUNK)
        tile_rows = min(target, (rows // _CHUNK) * _CHUNK)
        chunk = _CHUNK

    num_blocks = pl.cdiv(rows, tile_rows)
    n_split = min(_num_tensorcores(), num_blocks)
    steps = pl.cdiv(num_blocks, n_split)
    covered_rows = n_split * steps * tile_rows

    # --- Input layout --------------------------------------------------------
    zero_copy = (n % (_LANES * 8) == 0)   # rows is a multiple of 8: reshape only
    if zero_copy:
        # No jnp.pad full-array copy: pass the raw (rows, 128) reshape; ragged
        # tail blocks are masked in-kernel.
        args = [a.reshape(rows, _LANES) for a in inputs]
        array_rows = rows
        needs_mask = covered_rows != rows
    else:
        # Rare ragged case (n % 1024 != 0): one unavoidable copy.  Encode the
        # mask in the pad values: gt/pred -> 1, change -> 0 gives d1 = d2 = 0
        # and 0 * log(|1/2|) = 0, so no in-kernel masking is needed.
        # TODO(synk): n % 128 == 0 but n % 1024 != 0 could also go zero-copy
        # with an 8-row-unaligned tail block; kept on the pad path for safety.
        pad_vals = (1.0, 1.0, 1.0, 1.0, 0.0, 0.0)
        pad_len = covered_rows * _LANES - n
        args = [jnp.pad(a.reshape(-1), (0, pad_len),
                        constant_values=v).reshape(covered_rows, _LANES)
                for a, v in zip(inputs, pad_vals)]
        array_rows = covered_rows
        needs_mask = False

    last_block = pl.cdiv(array_rows, tile_rows) - 1

    kernel = functools.partial(
        _interaction_loss_kernel,
        steps_per_split=steps, tile_rows=tile_rows, chunk_rows=chunk,
        valid_rows=rows, needs_mask=needs_mask)

    def in_index(s, i):
        # Clamp so split-rounding never produces a fully out-of-bounds block;
        # the row mask zeroes any (duplicated) clamped block's contribution.
        return (jnp.minimum(s * steps + i, last_block), 0)

    in_spec = pl.BlockSpec((tile_rows, _LANES), in_index)
    part_shape = jax.ShapeDtypeStruct((n_split, 8, _LANES), jnp.float32)
    part_spec = pl.BlockSpec((1, 8, _LANES), lambda s, i: (s, 0, 0))

    bytes_in = sum(a.size * a.dtype.itemsize for a in args)
    n_eff = array_rows * _LANES
    cost = pl.CostEstimate(
        flops=22 * n_eff,
        transcendentals=4 * n_eff,
        bytes_accessed=bytes_in + 3 * n_split * 8 * _LANES * 4)

    sq1, sq2, ce = pl.pallas_call(
        kernel,
        out_shape=(part_shape, part_shape, part_shape),
        grid_spec=pltpu.PrefetchScalarGridSpec(
            num_scalar_prefetch=0,
            grid=(n_split, steps),
            in_specs=[in_spec] * 6,
            out_specs=[part_spec] * 3),
        compiler_params=pltpu.CompilerParams(
            dimension_semantics=("parallel", "arbitrary"),
            vmem_limit_bytes=_VMEM_LIMIT),
        cost_estimate=cost,
    )(*args)

    # Tiny epilogue: cross-lane reduce over 3 x (n_split, 8, 128) partials + sqrt.
    return jnp.sqrt(jnp.sum(sq1)) + jnp.sqrt(jnp.sum(sq2)) + jnp.sum(ce)


def interaction_loss_ref(predict, ground_true):
    pred_acted, pred_action, change_acted, change_action = [
        jnp.asarray(a, jnp.float32) for a in predict]
    gt_acted, gt_action = [jnp.asarray(a, jnp.float32) for a in ground_true]

    def ce(change, res, gt):
        return jnp.sum(change * jnp.log(jnp.abs(res / (gt + 1.0))))

    return (jnp.linalg.norm((change_acted - pred_acted + gt_action).ravel(), 2)
            + jnp.linalg.norm((change_action - pred_action + gt_acted).ravel(), 2)
            + ce(change_acted, pred_acted, gt_action)
            + ce(change_action, pred_action, gt_acted))


def _rand_inputs(shape, key, dtype=jnp.float32):
    ks = jax.random.split(key, 6)
    # Positive-valued inputs keep log(|res/(gt+1)|) away from singularities.
    arrs = [jax.random.uniform(k, shape, dtype, 0.1, 1.0) for k in ks]
    gt_acted, gt_action, pred_acted, pred_action, change_acted, change_action = arrs
    predict = (pred_acted, pred_action, change_acted, change_action)
    ground_true = (gt_acted, gt_action)
    return predict, ground_true


if __name__ == "__main__":
    key = jax.random.PRNGKey(0)
    # Small shapes consistent with the module (same-shaped prediction tensors,
    # e.g. (batch, channels, H, W)).  The extra shapes exercise the ragged
    # value-encoded-pad path and the multi-block zero-copy masked path.
    test_shapes = [
        (2, 4, 16, 16),    # primary: zero-copy, single block
        (2, 3, 7, 5),      # n % 1024 != 0 -> value-encoded pad path
        (2, 4, 96, 128),   # multi-block zero-copy path with partial last block
    ]
    for idx, shape in enumerate(test_shapes):
        predict, ground_true = _rand_inputs(shape, jax.random.fold_in(key, idx))
        loss = interaction_loss(predict, ground_true)
        jax.block_until_ready(loss)
        ref = interaction_loss_ref(predict, ground_true)
        assert jnp.allclose(loss, ref, rtol=5e-4, atol=1e-2), (shape, loss, ref)

    print("KERNEL_OK")
</pallas_src>

<mosaic_0001>
module attributes {stable_mosaic.version = 11 : i64} {
  func.func @_interaction_loss_kernel(%arg0: i32, %arg1: i32, %arg2: memref<16x128xf32, #tpu.memory_space<vmem>>, %arg3: memref<16x128xf32, #tpu.memory_space<vmem>>, %arg4: memref<16x128xf32, #tpu.memory_space<vmem>>, %arg5: memref<16x128xf32, #tpu.memory_space<vmem>>, %arg6: memref<16x128xf32, #tpu.memory_space<vmem>>, %arg7: memref<16x128xf32, #tpu.memory_space<vmem>>, %arg8: memref<1x8x128xf32, #tpu.memory_space<vmem>>, %arg9: memref<1x8x128xf32, #tpu.memory_space<vmem>>, %arg10: memref<1x8x128xf32, #tpu.memory_space<vmem>>) attributes {dimension_semantics = [#tpu.dimension_semantics<parallel>, #tpu.dimension_semantics<arbitrary>], iteration_bounds = array<i64: 1, 1>, scalar_prefetch = 0 : i64, scratch_operands = 0 : i64, tpu.core_type = #tpu.core_type<tc>, window_params = [{transform_indices = @transform_0, window_bounds = array<i64: 16, 128>}, {transform_indices = @transform_1, window_bounds = array<i64: 16, 128>}, {transform_indices = @transform_2, window_bounds = array<i64: 16, 128>}, {transform_indices = @transform_3, window_bounds = array<i64: 16, 128>}, {transform_indices = @transform_4, window_bounds = array<i64: 16, 128>}, {transform_indices = @transform_5, window_bounds = array<i64: 16, 128>}, {transform_indices = @transform_6, window_bounds = array<i64: 1, 8, 128>}, {transform_indices = @transform_7, window_bounds = array<i64: 1, 8, 128>}, {transform_indices = @transform_8, window_bounds = array<i64: 1, 8, 128>}]} {
    %c0_i32 = arith.constant 0 : i32
    %0 = arith.cmpi eq, %arg1, %c0_i32 : i32
    %1 = arith.extui %0 : i1 to i32
    %c0_i32_0 = arith.constant 0 : i32
    %2 = arith.cmpi ne, %1, %c0_i32_0 : i32
    scf.if %2 {
      %cst_31 = arith.constant 0.000000e+00 : f32
      %62 = vector.broadcast %cst_31 : f32 to vector<1x8x128xf32>
      %c0_32 = arith.constant 0 : index
      %c0_33 = arith.constant 0 : index
      %c0_34 = arith.constant 0 : index
      %63 = vector.load %arg8[%c0_32, %c0_33, %c0_34] : memref<1x8x128xf32, #tpu.memory_space<vmem>>, vector<1x8x128xf32>
      tpu.vector_store %arg8[%c0_32, %c0_33, %c0_34], %62 {strides = array<i32>} : memref<1x8x128xf32, #tpu.memory_space<vmem>>, vector<1x8x128xf32>,
      %cst_35 = arith.constant 0.000000e+00 : f32
      %64 = vector.broadcast %cst_35 : f32 to vector<1x8x128xf32>
      %c0_36 = arith.constant 0 : index
      %c0_37 = arith.constant 0 : index
      %c0_38 = arith.constant 0 : index
      %65 = vector.load %arg9[%c0_36, %c0_37, %c0_38] : memref<1x8x128xf32, #tpu.memory_space<vmem>>, vector<1x8x128xf32>
      tpu.vector_store %arg9[%c0_36, %c0_37, %c0_38], %64 {strides = array<i32>} : memref<1x8x128xf32, #tpu.memory_space<vmem>>, vector<1x8x128xf32>,
      %cst_39 = arith.constant 0.000000e+00 : f32
      %66 = vector.broadcast %cst_39 : f32 to vector<1x8x128xf32>
      %c0_40 = arith.constant 0 : index
      %c0_41 = arith.constant 0 : index
      %c0_42 = arith.constant 0 : index
      %67 = vector.load %arg10[%c0_40, %c0_41, %c0_42] : memref<1x8x128xf32, #tpu.memory_space<vmem>>, vector<1x8x128xf32>
      tpu.vector_store %arg10[%c0_40, %c0_41, %c0_42], %66 {strides = array<i32>} : memref<1x8x128xf32, #tpu.memory_space<vmem>>, vector<1x8x128xf32>,
    } else {
    }
    %c0_i32_1 = arith.constant 0 : i32
    %c1_i32 = arith.constant 1 : i32
    %3 = arith.muli %c0_i32_1, %c1_i32 : i32
    %c0_i32_2 = arith.constant 0 : i32
    %4 = arith.addi %c0_i32_2, %3 : i32
    %c16_i32 = arith.constant 16 : i32
    %5 = arith.muli %4, %c16_i32 : i32
    %6 = tpu.assume_multiple %5, 16 : i32
    %7 = arith.index_cast %6 : i32 to index
    %c0 = arith.constant 0 : index
    %8 = vector.load %arg2[%7, %c0] : memref<16x128xf32, #tpu.memory_space<vmem>>, vector<16x128xf32>
    %9 = arith.index_cast %6 : i32 to index
    %c0_3 = arith.constant 0 : index
    %10 = vector.load %arg3[%9, %c0_3] : memref<16x128xf32, #tpu.memory_space<vmem>>, vector<16x128xf32>
    %11 = arith.index_cast %6 : i32 to index
    %c0_4 = arith.constant 0 : index
    %12 = vector.load %arg4[%11, %c0_4] : memref<16x128xf32, #tpu.memory_space<vmem>>, vector<16x128xf32>
    %13 = arith.index_cast %6 : i32 to index
    %c0_5 = arith.constant 0 : index
    %14 = vector.load %arg5[%13, %c0_5] : memref<16x128xf32, #tpu.memory_space<vmem>>, vector<16x128xf32>
    %15 = arith.index_cast %6 : i32 to index
    %c0_6 = arith.constant 0 : index
    %16 = vector.load %arg6[%15, %c0_6] : memref<16x128xf32, #tpu.memory_space<vmem>>, vector<16x128xf32>
    %17 = arith.index_cast %6 : i32 to index
    %c0_7 = arith.constant 0 : index
    %18 = vector.load %arg7[%17, %c0_7] : memref<16x128xf32, #tpu.memory_space<vmem>>, vector<16x128xf32>
    %19 = arith.subf %16, %12 : vector<16x128xf32>
    %20 = arith.addf %19, %10 : vector<16x128xf32>
    %21 = arith.subf %18, %14 : vector<16x128xf32>
    %22 = arith.addf %21, %8 : vector<16x128xf32>
    %cst = arith.constant 1.000000e+00 : f32
    %23 = vector.broadcast %cst : f32 to vector<16x128xf32>
    %24 = arith.addf %10, %23 : vector<16x128xf32>
    %25 = arith.divf %12, %24 : vector<16x128xf32>
    %26 = math.absf %25 : vector<16x128xf32>
    %27 = math.log %26 : vector<16x128xf32>
    %28 = arith.mulf %16, %27 : vector<16x128xf32>
    %cst_8 = arith.constant 1.000000e+00 : f32
    %29 = vector.broadcast %cst_8 : f32 to vector<16x128xf32>
    %30 = arith.addf %8, %29 : vector<16x128xf32>
    %31 = arith.divf %14, %30 : vector<16x128xf32>
    %32 = math.absf %31 : vector<16x128xf32>
    %33 = math.log %32 : vector<16x128xf32>
    %34 = arith.mulf %18, %33 : vector<16x128xf32>
    %35 = arith.addf %28, %34 : vector<16x128xf32>
    %c0_9 = arith.constant 0 : index
    %c0_10 = arith.constant 0 : index
    %c0_11 = arith.constant 0 : index
    %36 = vector.load %arg8[%c0_9, %c0_10, %c0_11] : memref<1x8x128xf32, #tpu.memory_space<vmem>>, vector<1x8x128xf32>
    %37 = vector.shape_cast %36 : vector<1x8x128xf32> to vector<8x128xf32>
    %38 = arith.mulf %20, %20 : vector<16x128xf32>
    %39 = vector.shape_cast %38 : vector<16x128xf32> to vector<2x8x128xf32>
    %cst_12 = arith.constant dense<0.000000e+00> : vector<8x128xf32>
    %40 = vector.multi_reduction <add>, %39, %cst_12 [0] : vector<2x8x128xf32> to vector<8x128xf32>
    %41 = arith.addf %37, %40 : vector<8x128xf32>
    %c0_13 = arith.constant 0 : index
    %c0_14 = arith.constant 0 : index
    %c0_15 = arith.constant 0 : index
    %42 = vector.load %arg8[%c0_13, %c0_14, %c0_15] : memref<1x8x128xf32, #tpu.memory_space<vmem>>, vector<1x8x128xf32>
    %43 = vector.shape_cast %42 : vector<1x8x128xf32> to vector<8x128xf32>
    %44 = vector.shape_cast %41 : vector<8x128xf32> to vector<1x8x128xf32>
    tpu.vector_store %arg8[%c0_13, %c0_14, %c0_15], %44 {strides = array<i32>} : memref<1x8x128xf32, #tpu.memory_space<vmem>>, vector<1x8x128xf32>,
    %c0_16 = arith.constant 0 : index
    %c0_17 = arith.constant 0 : index
    %c0_18 = arith.constant 0 : index
    %45 = vector.load %arg9[%c0_16, %c0_17, %c0_18] : memref<1x8x128xf32, #tpu.memory_space<vmem>>, vector<1x8x128xf32>
    %46 = vector.shape_cast %45 : vector<1x8x128xf32> to vector<8x128xf32>
    %47 = arith.mulf %22, %22 : vector<16x128xf32>
    %48 = vector.shape_cast %47 : vector<16x128xf32> to vector<2x8x128xf32>
    %cst_19 = arith.constant dense<0.000000e+00> : vector<8x128xf32>
    %49 = vector.multi_reduction <add>, %48, %cst_19 [0] : vector<2x8x128xf32> to vector<8x128xf32>
    %50 = arith.addf %46, %49 : vector<8x128xf32>
    %c0_20 = arith.constant 0 : index
    %c0_21 = arith.constant 0 : index
    %c0_22 = arith.constant 0 : index
    %51 = vector.load %arg9[%c0_20, %c0_21, %c0_22] : memref<1x8x128xf32, #tpu.memory_space<vmem>>, vector<1x8x128xf32>
    %52 = vector.shape_cast %51 : vector<1x8x128xf32> to vector<8x128xf32>
    %53 = vector.shape_cast %50 : vector<8x128xf32> to vector<1x8x128xf32>
    tpu.vector_store %arg9[%c0_20, %c0_21, %c0_22], %53 {strides = array<i32>} : memref<1x8x128xf32, #tpu.memory_space<vmem>>, vector<1x8x128xf32>,
    %c0_23 = arith.constant 0 : index
    %c0_24 = arith.constant 0 : index
    %c0_25 = arith.constant 0 : index
    %54 = vector.load %arg10[%c0_23, %c0_24, %c0_25] : memref<1x8x128xf32, #tpu.memory_space<vmem>>, vector<1x8x128xf32>
    %55 = vector.shape_cast %54 : vector<1x8x128xf32> to vector<8x128xf32>
    %56 = vector.shape_cast %35 : vector<16x128xf32> to vector<2x8x128xf32>
    %cst_26 = arith.constant dense<0.000000e+00> : vector<8x128xf32>
    %57 = vector.multi_reduction <add>, %56, %cst_26 [0] : vector<2x8x128xf32> to vector<8x128xf32>
    %58 = arith.addf %55, %57 : vector<8x128xf32>
    %c0_27 = arith.constant 0 : index
    %c0_28 = arith.constant 0 : index
    %c0_29 = arith.constant 0 : index
    %59 = vector.load %arg10[%c0_27, %c0_28, %c0_29] : memref<1x8x128xf32, #tpu.memory_space<vmem>>, vector<1x8x128xf32>
    %60 = vector.shape_cast %59 : vector<1x8x128xf32> to vector<8x128xf32>
    %61 = vector.shape_cast %58 : vector<8x128xf32> to vector<1x8x128xf32>
    tpu.vector_store %arg10[%c0_27, %c0_28, %c0_29], %61 {strides = array<i32>} : memref<1x8x128xf32, #tpu.memory_space<vmem>>, vector<1x8x128xf32>,
    %c1_i32_30 = arith.constant 1 : i32
    return
  }
  func.func @transform_0(%arg0: i32, %arg1: i32) -> (i32, i32) {
    %c1_i32 = arith.constant 1 : i32
    %0 = arith.muli %arg0, %c1_i32 : i32
    %1 = arith.addi %0, %arg1 : i32
    %c0_i32 = arith.constant 0 : i32
    %2 = arith.minsi %1, %c0_i32 : i32
    %c0_i32_0 = arith.constant 0 : i32
    %c0_i32_1 = arith.constant 0 : i32
    return %2, %c0_i32_0 : i32, i32
  }
  func.func @transform_1(%arg0: i32, %arg1: i32) -> (i32, i32) {
    %c1_i32 = arith.constant 1 : i32
    %0 = arith.muli %arg0, %c1_i32 : i32
    %1 = arith.addi %0, %arg1 : i32
    %c0_i32 = arith.constant 0 : i32
    %2 = arith.minsi %1, %c0_i32 : i32
    %c0_i32_0 = arith.constant 0 : i32
    %c0_i32_1 = arith.constant 0 : i32
    return %2, %c0_i32_0 : i32, i32
  }
  func.func @transform_2(%arg0: i32, %arg1: i32) -> (i32, i32) {
    %c1_i32 = arith.constant 1 : i32
    %0 = arith.muli %arg0, %c1_i32 : i32
    %1 = arith.addi %0, %arg1 : i32
    %c0_i32 = arith.constant 0 : i32
    %2 = arith.minsi %1, %c0_i32 : i32
    %c0_i32_0 = arith.constant 0 : i32
    %c0_i32_1 = arith.constant 0 : i32
    return %2, %c0_i32_0 : i32, i32
  }
  func.func @transform_3(%arg0: i32, %arg1: i32) -> (i32, i32) {
    %c1_i32 = arith.constant 1 : i32
    %0 = arith.muli %arg0, %c1_i32 : i32
    %1 = arith.addi %0, %arg1 : i32
    %c0_i32 = arith.constant 0 : i32
    %2 = arith.minsi %1, %c0_i32 : i32
    %c0_i32_0 = arith.constant 0 : i32
    %c0_i32_1 = arith.constant 0 : i32
    return %2, %c0_i32_0 : i32, i32
  }
  func.func @transform_4(%arg0: i32, %arg1: i32) -> (i32, i32) {
    %c1_i32 = arith.constant 1 : i32
    %0 = arith.muli %arg0, %c1_i32 : i32
    %1 = arith.addi %0, %arg1 : i32
    %c0_i32 = arith.constant 0 : i32
    %2 = arith.minsi %1, %c0_i32 : i32
    %c0_i32_0 = arith.constant 0 : i32
    %c0_i32_1 = arith.constant 0 : i32
    return %2, %c0_i32_0 : i32, i32
  }
  func.func @transform_5(%arg0: i32, %arg1: i32) -> (i32, i32) {
    %c1_i32 = arith.constant 1 : i32
    %0 = arith.muli %arg0, %c1_i32 : i32
    %1 = arith.addi %0, %arg1 : i32
    %c0_i32 = arith.constant 0 : i32
    %2 = arith.minsi %1, %c0_i32 : i32
    %c0_i32_0 = arith.constant 0 : i32
    %c0_i32_1 = arith.constant 0 : i32
    return %2, %c0_i32_0 : i32, i32
  }
  func.func @transform_6(%arg0: i32, %arg1: i32) -> (i32, i32, i32) {
    %c0_i32 = arith.constant 0 : i32
    %c0_i32_0 = arith.constant 0 : i32
    %c0_i32_1 = arith.constant 0 : i32
    return %arg0, %c0_i32, %c0_i32_0 : i32, i32, i32
  }
  func.func @transform_7(%arg0: i32, %arg1: i32) -> (i32, i32, i32) {
    %c0_i32 = arith.constant 0 : i32
    %c0_i32_0 = arith.constant 0 : i32
    %c0_i32_1 = arith.constant 0 : i32
    return %arg0, %c0_i32, %c0_i32_0 : i32, i32, i32
  }
  func.func @transform_8(%arg0: i32, %arg1: i32) -> (i32, i32, i32) {
    %c0_i32 = arith.constant 0 : i32
    %c0_i32_0 = arith.constant 0 : i32
    %c0_i32_1 = arith.constant 0 : i32
    return %arg0, %c0_i32, %c0_i32_0 : i32, i32, i32
  }
}

</mosaic_0001>

<bundles_post_ra>
// kernel: tpu_custom_call.1
= control target key start
LH: loop header
LB: loop body
LE: loop exit
PB: predicated region body
PF: predicated region fallthrough
CT: control target
= control target key end

     0   :  { %14 = vsyncpa [#allocation3], 0  ;;  %s733_s0 = inlined_call_operand.hbm [shape: f32[16,128], index: 0, kind: input, shape index: {}]   ;;  %s734_s1 = inlined_call_operand.hbm [shape: f32[16,128], index: 1, kind: input, shape index: {}]   ;;  %s735_s2 = inlined_call_operand.hbm [shape: f32[16,128], index: 2, kind: input, shape index: {}]   ;;  %s736_s3 = inlined_call_operand.hbm [shape: f32[16,128], index: 3, kind: input, shape index: {}]   ;;  %s737_s4 = inlined_call_operand.hbm [shape: f32[16,128], index: 4, kind: input, shape index: {}]   ;;  %s738_s5 = inlined_call_operand.vmem [shape: f32[16,128], index: 5, kind: input, shape index: {}]   ;;  %s739_s6 = inlined_call_operand.hbm [shape: f32[1,8,128], index: 6, kind: output, shape index: {0}]   ;;  %s740_s7 = inlined_call_operand.hbm [shape: f32[1,8,128], index: 7, kind: output, shape index: {1}]   ;;  %s741_s8 = inlined_call_operand.hbm [shape: f32[1,8,128], index: 8, kind: output, shape index: {2}]  }
   0x1   :  { %15 = vsyncpa [#allocation6], 0 }
   0x2   :  { %16 = vsyncpa [#allocation9], 0 }
   0x3   :  { %17 = vsyncpa [#allocation4], 0 }
   0x4   :  { %18 = vsyncpa [#allocation13], 0  ;;  %s524_s27 = smov [#allocation5]   ;;  %s525_s29 = smov [#allocation8]  }
   0x5   :  { %s48_s28 = sshll.u32 %s524_s27, 4  ;;  %s84_s30 = sshll.u32 %s525_s29, 4  ;;  %s49_s28 = int_to_ptr.vmem [resolvable:$true] %s48_s28  ;;  %s579_s30 = int_to_ptr.vmem [resolvable:$true] %s84_s30 }
   0x6   :  { %s338_s11 = scalar_lea.hbm %s734_s1, 256 }
   0x7   :  { %p339_p0 = scmp.ne.s32.totalorder %s734_s1, %s338_s11  ;;  %p342_p1 = scmp.lt.u32.totalorder %s338_s11, %s734_s1 }
   0x9   :  { %p344_p2 = pnand %p342_p1, %p339_p0 }
   0xb   :  { %347 = shalt.err (!%p344_p2)
}
   0xc   :  { %s348_s16 = scalar_lea.vmem %s49_s28, 256  ;;  %p353_p4 = scmp.lt.s32.totalorder %s49_s28, %s49_s28 }
   0xd   :  { %p349_p3 = scmp.ne.s32.totalorder %s49_s28, %s348_s16  ;;  %p354_p5 = scmp.lt.s32.totalorder %s348_s16, %s348_s16 }
   0xf   :  { %p355_p6 = por %p354_p5, %p353_p4 }
  0x11   :  { %p356_p7 = pnand %p355_p6, %p349_p3 }
  0x13   :  { %359 = shalt.err (!%p356_p7)
}
  0x14   :  { %s526_s17 = smov 128   ;;  %s527_s18 = smov 8  }
  0x15   :  { %54 = dma.hbm_to_vmem [thread:$0]  %s734_s1, 256, %s49_s28, [#allocation6], %s526_s17, %s526_s17, %s527_s18  }
  0x16   :  { %s360_s23 = scalar_lea.hbm %s736_s3, 256 }
  0x17   :  { %p361_p8 = scmp.ne.s32.totalorder %s736_s3, %s360_s23  ;;  %p364_p9 = scmp.lt.u32.totalorder %s360_s23, %s736_s3 }
  0x19   :  { %p366_p10 = pnand %p364_p9, %p361_p8 }
  0x1b   :  { %369 = shalt.err (!%p366_p10)
}
  0x1c   :  { %s370_s29 = scalar_lea.vmem %s579_s30, 256  ;;  %p375_p12 = scmp.lt.s32.totalorder %s579_s30, %s579_s30 }
  0x1d   :  { %p371_p11 = scmp.ne.s32.totalorder %s579_s30, %s370_s29  ;;  %p376_p13 = scmp.lt.s32.totalorder %s370_s29, %s370_s29 }
  0x1f   :  { %p377_p0 = por %p376_p13, %p375_p12 }
  0x21   :  { %p378_p1 = pnand %p377_p0, %p371_p11 }
  0x23   :  { %381 = shalt.err (!%p378_p1)
}
  0x24   :  { %90 = dma.hbm_to_vmem [thread:$0]  %s736_s3, 256, %s579_s30, [#allocation9], %s526_s17, %s526_s17, %s527_s18  }
  0x25   :  { %s528_s9 = smov [#allocation2]   ;;  %s529_s11 = smov [#allocation7]  }
  0x26   :  { %s30_s10 = sshll.u32 %s528_s9, 4  ;;  %s66_s12 = sshll.u32 %s529_s11, 4  ;;  %s31_s10 = int_to_ptr.vmem [resolvable:$true] %s30_s10  ;;  %s616_s12 = int_to_ptr.vmem [resolvable:$true] %s66_s12 }
  0x27   :  { %s382_s15 = scalar_lea.hbm %s733_s0, 256 }
  0x28   :  { %p383_p2 = scmp.ne.s32.totalorder %s733_s0, %s382_s15  ;;  %p386_p3 = scmp.lt.u32.totalorder %s382_s15, %s733_s0 }
  0x2a   :  { %p388_p4 = pnand %p386_p3, %p383_p2 }
  0x2c   :  { %391 = shalt.err (!%p388_p4)
}
  0x2d   :  { %s392_s3 = scalar_lea.vmem %s31_s10, 256  ;;  %p397_p6 = scmp.lt.s32.totalorder %s31_s10, %s31_s10 }
  0x2e   :  { %p393_p5 = scmp.ne.s32.totalorder %s31_s10, %s392_s3  ;;  %p398_p7 = scmp.lt.s32.totalorder %s392_s3, %s392_s3 }
  0x30   :  { %p399_p8 = por %p398_p7, %p397_p6 }
  0x32   :  { %p400_p9 = pnand %p399_p8, %p393_p5 }
  0x34   :  { %403 = shalt.err (!%p400_p9)
}
  0x35   :  { %36 = dma.hbm_to_vmem [thread:$0]  %s733_s0, 256, %s31_s10, [#allocation3], %s526_s17, %s526_s17, %s527_s18  }
  0x36   :  { %s404_s25 = scalar_lea.hbm %s735_s2, 256 }
  0x37   :  { %p405_p10 = scmp.ne.s32.totalorder %s735_s2, %s404_s25  ;;  %p408_p11 = scmp.lt.u32.totalorder %s404_s25, %s735_s2 }
  0x39   :  { %p410_p12 = pnand %p408_p11, %p405_p10 }
  0x3b   :  { %413 = shalt.err (!%p410_p12)
}
  0x3c   :  { %s414_s28 = scalar_lea.vmem %s616_s12, 256  ;;  %p419_p0 = scmp.lt.s32.totalorder %s616_s12, %s616_s12 }
  0x3d   :  { %p415_p13 = scmp.ne.s32.totalorder %s616_s12, %s414_s28  ;;  %p420_p1 = scmp.lt.s32.totalorder %s414_s28, %s414_s28 }
  0x3f   :  { %p421_p2 = por %p420_p1, %p419_p0 }
  0x41   :  { %p422_p3 = pnand %p421_p2, %p415_p13 }
  0x43   :  { %425 = shalt.err (!%p422_p3)
}
  0x44   :  { %72 = dma.hbm_to_vmem [thread:$0]  %s735_s2, 256, %s616_s12, [#allocation6], %s526_s17, %s526_s17, %s527_s18  }
  0x45   :  { %s530_s10 = smov [#allocation10]   ;;  %s426_s15 = scalar_lea.hbm %s737_s4, 256 }
  0x46   :  { %s102_s11 = sshll.u32 %s530_s10, 4  ;;  %p427_p4 = scmp.ne.s32.totalorder %s737_s4, %s426_s15  ;;  %s103_s11 = int_to_ptr.vmem [resolvable:$true] %s102_s11 }
  0x47   :  { %p430_p5 = scmp.lt.u32.totalorder %s426_s15, %s737_s4 }
  0x49   :  { %p432_p6 = pnand %p430_p5, %p427_p4 }
  0x4b   :  { %435 = shalt.err (!%p432_p6)
}
  0x4c   :  { %s436_s3 = scalar_lea.vmem %s103_s11, 256  ;;  %p441_p8 = scmp.lt.s32.totalorder %s103_s11, %s103_s11 }
  0x4d   :  { %p437_p7 = scmp.ne.s32.totalorder %s103_s11, %s436_s3  ;;  %p442_p9 = scmp.lt.s32.totalorder %s436_s3, %s436_s3 }
  0x4f   :  { %p443_p10 = por %p442_p9, %p441_p8 }
  0x51   :  { %p444_p11 = pnand %p443_p10, %p437_p7 }
  0x53   :  { %447 = shalt.err (!%p444_p11)
}
  0x54   :  { %108 = dma.hbm_to_vmem [thread:$0]  %s737_s4, 256, %s103_s11, [#allocation9], %s526_s17, %s526_s17, %s527_s18  }
  0x55   :  { %514 = dma.done.wait [#allocation3], 256  }
  0x56   :  { %515 = vsyncadd [#allocation3], 4294967040 }
  0x57   :  { %516 = dma.done.wait [#allocation6], 512  }
  0x58   :  { %517 = vsyncadd [#allocation6], 4294966784 }
  0x59   :  { %518 = dma.done.wait [#allocation9], 512  }
  0x5a   :  { %519 = vsyncadd [#allocation9], 4294966784  ;;  %v185_v0 = vld [vmem:[#allocation2] sm:$0xff]  ;;  %v186_v1 = vld [vmem:[#allocation2 + $0x8] sm:$0xff]  ;;  %s531_s4 = smov [#allocation12]   ;;  %s532_s17 = smov [#allocation11]  }
  0x5b   :  { %v191_v2 = vld [vmem:[#allocation8] sm:$0xff]  ;;  %v192_v3 = vld [vmem:[#allocation8 + $0x8] sm:$0xff]  ;;  %v671_v4 = vld [vmem:[%s738_s5] sm:$0xff]  ;;  %v219_v6 = vadd.f32 1.0, %v185_v0  ;;  %v220_v7 = vadd.f32 1.0, %v186_v1  ;;  %s257_s18 = sshll.u32 %s532_s17, 4  ;;  %s686_s18 = int_to_ptr.vmem [resolvable:$true] %s257_s18 }
  0x5c   :  { %v676_v5 = vld [vmem:[%s738_s5 + $0x8] sm:$0xff]  ;;  %v201_v8 = vsub.f32 %v671_v4, %v191_v2  ;;  %v187_v10 = vld [vmem:[#allocation5] sm:$0xff]  ;;  %v188_v11 = vld [vmem:[#allocation5 + $0x8] sm:$0xff]  ;;  %s267_s5 = sshll.u32 %s531_s4, 4  ;;  %s268_s5 = int_to_ptr.vmem [resolvable:$true] %s267_s5 }
  0x5d   :  { %v202_v9 = vsub.f32 %v676_v5, %v192_v3  ;;  %322 = vrcp.f32 %v219_v6  ;;  %v189_v12 = vld [vmem:[#allocation7] sm:$0xff]  ;;  %v682_v14 = vld [vmem:[#allocation10 + $0x8] sm:$0xff]  ;;  %v205_v15 = vadd.f32 1.0, %v187_v10  ;;  %v206_v16 = vadd.f32 1.0, %v188_v11  ;;  %s448_s25 = scalar_lea.vmem %s268_s5, 128  ;;  %p453_p13 = scmp.lt.s32.totalorder %s268_s5, %s268_s5 }
  0x5e   :  { %v680_v13 = vld [vmem:[#allocation10] sm:$0xff]  ;;  %v203_v17 = vadd.f32 %v201_v8, %v185_v0  ;;  %324 = vrcp.f32 %v220_v7  ;;  %v190_v19 = vld [vmem:[#allocation7 + $0x8] sm:$0xff]  ;;  %p449_p12 = scmp.ne.s32.totalorder %s268_s5, %s448_s25  ;;  %p454_p0 = scmp.lt.s32.totalorder %s448_s25, %s448_s25 }
  0x5f   :  { %v204_v18 = vadd.f32 %v202_v9, %v186_v1  ;;  %v197_v20 = vsub.f32 %v680_v13, %v189_v12  ;;  %v198_v21 = vsub.f32 %v682_v14, %v190_v19  ;;  %326 = vrcp.f32 %v205_v15 }
  0x60   :  { %v242_v22 = vmul.f32 %v203_v17, %v203_v17  ;;  %328 = vrcp.f32 %v206_v16  ;;  %p455_p1 = por %p454_p0, %p453_p13 }
  0x61   :  { %v243_v23 = vmul.f32 %v204_v18, %v204_v18  ;;  %v199_v24 = vadd.f32 %v197_v20, %v187_v10  ;;  %v200_v25 = vadd.f32 %v198_v21, %v188_v11 }
  0x62   :  { %p456_p2 = pnand %p455_p1, %p449_p12 }
  0x63   :  { %v244_v26 = vadd.f32 %v243_v23, %v242_v22  ;;  %v236_v27 = vmul.f32 %v199_v24, %v199_v24  ;;  %v237_v28 = vmul.f32 %v200_v25, %v200_v25 }
  0x65   :  { %v238_v29 = vadd.f32 %v237_v28, %v236_v27  ;;  %246 = vst [vmem:[#allocation12] sm:$0xff] %v244_v26 }
  0x67   :  { %v323_v30 = vpop.eup %322 }
  0x68   :  { %459 = shalt.err (!%p456_p2)
}
  0x69   :  { %s460_s29 = scalar_lea.hbm %s740_s7, 128 }
  0x6a   :  { %p461_p3 = scmp.ne.s32.totalorder %s740_s7, %s460_s29  ;;  %p464_p4 = scmp.lt.u32.totalorder %s460_s29, %s740_s7 }
  0x6c   :  { %p466_p5 = pnand %p464_p4, %p461_p3 }
  0x6e   :  { %469 = shalt.err (!%p466_p5)
}
  0x6f   :  { %270 = dma.vmem_to_hbm [thread:$0]  %s268_s5, 128, %s740_s7, [#allocation13]   ;;  %v325_v31 = vpop.eup %324  ;;  %v222_v32 = vmul.f32 %v323_v30, %v191_v2  ;;  %240 = vst [vmem:[#allocation11] sm:$0xff] %v238_v29 }
  0x70   :  { %v327_v33 = vpop.eup %326  ;;  %v224_v34 = vmul.f32 %v325_v31, %v192_v3  ;;  %s470_s13 = scalar_lea.vmem %s686_s18, 128  ;;  %p475_p7 = scmp.lt.s32.totalorder %s686_s18, %s686_s18 }
  0x71   :  { %v329_v35 = vpop.eup %328  ;;  %v225_v36 = vand.u32 2147483647, %v222_v32  ;;  %v208_v37 = vmul.f32 %v327_v33, %v189_v12  ;;  %p471_p6 = scmp.ne.s32.totalorder %s686_s18, %s470_s13  ;;  %p476_p8 = scmp.lt.s32.totalorder %s470_s13, %s470_s13 }
  0x73   :  { %p477_p9 = por %p476_p8, %p475_p7 }
  0x75   :  { %p478_p10 = pnand %p477_p9, %p471_p6 }
  0x77   :  { %481 = shalt.err (!%p478_p10)
}
  0x78   :  { %s482_s7 = scalar_lea.hbm %s739_s6, 128 }
  0x79   :  { %p483_p11 = scmp.ne.s32.totalorder %s739_s6, %s482_s7  ;;  %p486_p12 = scmp.lt.u32.totalorder %s482_s7, %s739_s6 }
  0x7b   :  { %p488_p13 = pnand %p486_p12, %p483_p11 }
  0x7d   :  { %491 = shalt.err (!%p488_p13)
}
  0x7e   :  { %260 = dma.vmem_to_hbm [thread:$0]  %s686_s18, 128, %s739_s6, [#allocation4]   ;;  %v226_v38 = vand.u32 2147483647, %v224_v34  ;;  %v210_v39 = vmul.f32 %v329_v35, %v190_v19  ;;  %330 = vlog2.f32 %v225_v36  ;;  %v211_v40 = vand.u32 2147483647, %v208_v37 }
  0x7f   :  { %s533_s6 = smov [#allocation14]  }
  0x80   :  { %332 = vlog2.f32 %v226_v38  ;;  %v212_v41 = vand.u32 2147483647, %v210_v39  ;;  %s277_s12 = sshll.u32 %s533_s6, 4  ;;  %s278_s12 = int_to_ptr.vmem [resolvable:$true] %s277_s12 }
  0x81   :  { %334 = vlog2.f32 %v211_v40  ;;  %s492_s30 = scalar_lea.vmem %s278_s12, 128  ;;  %p497_p1 = scmp.lt.s32.totalorder %s278_s12, %s278_s12 }
  0x82   :  { %336 = vlog2.f32 %v212_v41  ;;  %p493_p0 = scmp.ne.s32.totalorder %s278_s12, %s492_s30  ;;  %p498_p2 = scmp.lt.s32.totalorder %s492_s30, %s492_s30 }
  0x84   :  { %p499_p3 = por %p498_p2, %p497_p1 }
  0x86   :  { %p500_p4 = pnand %p499_p3, %p493_p0 }
  0x88   :  { %v331_v42 = vpop.eup %330 }
  0x89   :  { %v228_v44 = vmul.f32 0.6931472, %v331_v42 }
  0x8a   :  { %v333_v43 = vpop.eup %332 }
  0x8b   :  { %v335_v45 = vpop.eup %334  ;;  %v230_v46 = vmul.f32 0.6931472, %v333_v43  ;;  %v231_v49 = vmul.f32 %v228_v44, %v671_v4 }
  0x8c   :  { %v337_v47 = vpop.eup %336  ;;  %v214_v48 = vmul.f32 0.6931472, %v335_v45 }
  0x8d   :  { %v216_v50 = vmul.f32 0.6931472, %v337_v47  ;;  %v232_v51 = vmul.f32 %v230_v46, %v676_v5 }
  0x8e   :  { %v217_v52 = vmul.f32 %v214_v48, %v680_v13 }
  0x8f   :  { %v218_v53 = vmul.f32 %v216_v50, %v682_v14 }
  0x90   :  { %v233_v54 = vadd.f32 %v231_v49, %v217_v52 }
  0x91   :  { %v234_v55 = vadd.f32 %v232_v51, %v218_v53 }
  0x93   :  { %v248_v56 = vadd.f32 %v234_v55, %v233_v54 }
  0x95   :  { %250 = vst [vmem:[#allocation14] sm:$0xff] %v248_v56 }
  0x96   :  { %503 = shalt.err (!%p500_p4)
}
  0x97   :  { %s504_s24 = scalar_lea.hbm %s741_s8, 128 }
  0x98   :  { %p505_p5 = scmp.ne.s32.totalorder %s741_s8, %s504_s24  ;;  %p508_p6 = scmp.lt.u32.totalorder %s504_s24, %s741_s8 }
  0x9a   :  { %p510_p7 = pnand %p508_p6, %p505_p5 }
  0x9c   :  { %513 = shalt.err (!%p510_p7)
}
  0x9d   :  { %280 = dma.vmem_to_hbm [thread:$0]  %s278_s12, 128, %s741_s8, [#allocation13]  }
  0x9e   :  { %520 = dma.done.wait [#allocation4], 128  }
  0x9f   :  { %521 = vsyncadd [#allocation4], 4294967168 }
  0xa0   :  { %522 = dma.done.wait [#allocation13], 256  }
  0xa1   :  { %523 = vsyncadd [#allocation13], 4294967040 }
  0xa2   :  { %290 = vsyncpa [#allocation3], 1 }
  0xa3   :  { %291 = vsyncpa [#allocation6], 1 }
  0xa4   :  { %292 = vsyncpa [#allocation9], 1 }
  0xa5   :  { %293 = vsyncpa [#allocation4], 1 }
  0xa6   :  { %294 = vsyncpa [#allocation13], 1 }

</bundles_post_ra>
